<compile_context>
chip_gen: v7x
topology: tpu7x:2x2x1
jax: 0.10.0
libtpu: 0.0.40
codegen_flags: <defaults>
</compile_context>

<pallas_src>
import functools

import jax
import jax.numpy as jnp
from jax import lax
from jax.experimental import pallas as pl
from jax.experimental.pallas import tpu as pltpu


def _round_up(x, m):
    return (x + m - 1) // m * m


def _matmul_bn_relu_kernel(p_ref, w_ref, sb_ref, o_ref):
    # p_ref:  (TM, Kp) bf16  im2col patches tile (rows = output pixels)
    # w_ref:  (Kp, Cp) bf16  reshaped conv weight, VMEM-resident (constant map)
    # sb_ref: (2,  Cp) f32   row 0 = folded BN scale, row 1 = folded BN bias
    # o_ref:  (TM, Cp)       output tile
    acc = jnp.dot(p_ref[...], w_ref[...],
                  preferred_element_type=jnp.float32)       # single MXU dot
    y = acc * sb_ref[0:1, :] + sb_ref[1:2, :]                # fused BN (f32)
    o_ref[...] = jnp.maximum(y, 0.0).astype(o_ref.dtype)     # fused ReLU


@functools.partial(jax.jit,
                   static_argnames=("stride", "padding", "out_dtype"))
def basic_conv_forward_nhwc(x_nhwc, w_hwio, gamma, beta, running_mean,
                            running_var, *, stride=1, padding=1, eps=1e-5,
                            out_dtype=None):
    """Conv(bias=False) + BN(inference) + ReLU, NHWC in / NHWC out."""
    N, H, W, Cin = x_nhwc.shape
    KH, KW, _, Cout = w_hwio.shape
    sh = sw = stride
    p = padding
    Ho = (H + 2 * p - KH) // sh + 1
    Wo = (W + 2 * p - KW) // sw + 1
    out_dtype = x_nhwc.dtype if out_dtype is None else out_dtype

    # --- early bf16 cast, then im2col (fold KH*KW taps into matmul K dim) ---
    x_bf = x_nhwc.astype(jnp.bfloat16)
    w_bf = w_hwio.astype(jnp.bfloat16)
    x_pad = jnp.pad(x_bf, ((0, 0), (p, p), (p, p), (0, 0)))
    taps = [
        x_pad[:, kh:kh + sh * (Ho - 1) + 1:sh, kw:kw + sw * (Wo - 1) + 1:sw, :]
        for kh in range(KH) for kw in range(KW)
    ]
    patches = jnp.concatenate(taps, axis=-1)          # (N, Ho, Wo, KH*KW*Cin)
    K = KH * KW * Cin
    M = N * Ho * Wo
    patches = patches.reshape(M, K)

    # --- padding: lane-dense Cout; K padded only to what the MXU needs ------
    TM = 512 if M >= 2048 else 256
    Mp = _round_up(M, TM)
    Kp = _round_up(K, 128) if K >= 128 else _round_up(K, 16)
    Cp = _round_up(Cout, 128)

    patches = jnp.pad(patches, ((0, Mp - M), (0, Kp - K)))          # bf16
    w2d = jnp.pad(w_bf.reshape(K, Cout), ((0, Kp - K), (0, Cp - Cout)))

    # --- fold BN into one resident (2, Cp) scale/bias table (f32) -----------
    inv_std = lax.rsqrt(running_var.astype(jnp.float32) + eps)
    scale = gamma.astype(jnp.float32) * inv_std
    bias = beta.astype(jnp.float32) - running_mean.astype(jnp.float32) * scale
    sb = jnp.stack([jnp.pad(scale, (0, Cp - Cout)),
                    jnp.pad(bias, (0, Cp - Cout))])                 # (2, Cp)

    out2d = pl.pallas_call(
        _matmul_bn_relu_kernel,
        out_shape=jax.ShapeDtypeStruct((Mp, Cp), out_dtype),
        grid_spec=pltpu.PrefetchScalarGridSpec(
            num_scalar_prefetch=0,
            grid=(Mp // TM,),
            in_specs=[
                pl.BlockSpec((TM, Kp), lambda i: (i, 0)),   # streamed patches
                pl.BlockSpec((Kp, Cp), lambda i: (0, 0)),   # weight: 1 DMA
                pl.BlockSpec((2, Cp), lambda i: (0, 0)),    # BN table: 1 DMA
            ],
            out_specs=pl.BlockSpec((TM, Cp), lambda i: (i, 0)),
        ),
        compiler_params=pltpu.CompilerParams(
            dimension_semantics=("parallel",),
            vmem_limit_bytes=48 * 1024 * 1024),
    )(patches, w2d, sb)

    return out2d[:M, :Cout].reshape(N, Ho, Wo, Cout)


@functools.partial(jax.jit,
                   static_argnames=("stride", "padding", "out_dtype"))
def basic_conv_forward(x_nchw, weight_oihw, gamma, beta, running_mean,
                       running_var, *, stride=1, padding=1, eps=1e-5,
                       out_dtype=None):
    """PyTorch-compatible NCHW adapter around the NHWC kernel.

    Note: the NCHW<->NHWC transposes here are interface glue only; call
    `basic_conv_forward_nhwc` end-to-end to avoid the extra HBM passes.
    """
    x_nhwc = jnp.transpose(x_nchw, (0, 2, 3, 1))
    w_hwio = jnp.transpose(weight_oihw, (2, 3, 1, 0))
    out_nhwc = basic_conv_forward_nhwc(
        x_nhwc, w_hwio, gamma, beta, running_mean, running_var,
        stride=stride, padding=padding, eps=eps, out_dtype=out_dtype)
    return jnp.transpose(out_nhwc, (0, 3, 1, 2))


def _reference_forward(x_nchw, weight_oihw, gamma, beta, running_mean,
                       running_var, stride=1, padding=1, eps=1e-5):
    """Pure-JAX reference (conv + inference BN + ReLU) for validation."""
    conv = lax.conv_general_dilated(
        x_nchw, weight_oihw, window_strides=(stride, stride),
        padding=((padding, padding), (padding, padding)),
        dimension_numbers=("NCHW", "OIHW", "NCHW"))
    inv_std = lax.rsqrt(running_var + eps)
    scale = (gamma * inv_std).reshape(1, -1, 1, 1)
    bias = (beta - running_mean * gamma * inv_std).reshape(1, -1, 1, 1)
    return jnp.maximum(conv * scale + bias, 0.0)


if __name__ == "__main__":
    key = jax.random.PRNGKey(0)
    k_x, k_w, k_g, k_b, k_m, k_v = jax.random.split(key, 6)

    N, Cin, H, W = 2, 4, 16, 16
    Cout, KH, KW = 8, 3, 3

    x = jax.random.normal(k_x, (N, Cin, H, W), dtype=jnp.float32)
    weight = jax.random.normal(k_w, (Cout, Cin, KH, KW), dtype=jnp.float32) * 0.1
    gamma = 1.0 + 0.1 * jax.random.normal(k_g, (Cout,), dtype=jnp.float32)
    beta = 0.1 * jax.random.normal(k_b, (Cout,), dtype=jnp.float32)
    running_mean = 0.1 * jax.random.normal(k_m, (Cout,), dtype=jnp.float32)
    running_var = jnp.abs(jax.random.normal(k_v, (Cout,), dtype=jnp.float32)) + 0.5

    out = basic_conv_forward(x, weight, gamma, beta, running_mean, running_var,
                             stride=1, padding=1)
    out = jax.block_until_ready(out)
    assert out.shape == (N, Cout, H, W), out.shape

    # Kernel multiplies in bf16 (f32 accumulation); compare against the f32
    # reference evaluated on bf16-quantized operands for a tight check.
    x_q = x.astype(jnp.bfloat16).astype(jnp.float32)
    w_q = weight.astype(jnp.bfloat16).astype(jnp.float32)
    ref = _reference_forward(x_q, w_q, gamma, beta, running_mean, running_var,
                             stride=1, padding=1)
    assert jnp.allclose(out, ref, atol=1e-3, rtol=1e-3), float(
        jnp.max(jnp.abs(out - ref)))

    print("KERNEL_OK")
</pallas_src>

<mosaic_0001>
module attributes {stable_mosaic.version = 11 : i64} {
  func.func @_matmul_bn_relu_kernel(%arg0: i32, %arg1: memref<256x48xbf16, #tpu.memory_space<vmem>>, %arg2: memref<48x128xbf16, #tpu.memory_space<vmem>>, %arg3: memref<2x128xf32, #tpu.memory_space<vmem>>, %arg4: memref<256x128xf32, #tpu.memory_space<vmem>>) attributes {dimension_semantics = [#tpu.dimension_semantics<parallel>], iteration_bounds = array<i64: 2>, scalar_prefetch = 0 : i64, scratch_operands = 0 : i64, tpu.core_type = #tpu.core_type<tc>, window_params = [{transform_indices = @transform_0, window_bounds = array<i64: 256, 48>}, {pipeline_mode = #tpu.pipeline_mode<synchronous>, transform_indices = @transform_1, window_bounds = array<i64: 48, 128>}, {pipeline_mode = #tpu.pipeline_mode<synchronous>, transform_indices = @transform_2, window_bounds = array<i64: 2, 128>}, {transform_indices = @transform_3, window_bounds = array<i64: 256, 128>}]} {
    %c0 = arith.constant 0 : index
    %c0_0 = arith.constant 0 : index
    %0 = vector.load %arg1[%c0, %c0_0] : memref<256x48xbf16, #tpu.memory_space<vmem>>, vector<256x48xbf16>
    %c0_1 = arith.constant 0 : index
    %c0_2 = arith.constant 0 : index
    %1 = vector.load %arg2[%c0_1, %c0_2] : memref<48x128xbf16, #tpu.memory_space<vmem>>, vector<48x128xbf16>
    %cst = arith.constant dense<0.000000e+00> : vector<256x128xf32>
    %2 = tpu.matmul %0, %1, %cst {dimension_numbers = #tpu.dot_dimension_numbers<[1], [0], [0], [1], [0, 0, 1, 1], [], []>} : vector<256x48xbf16>, vector<48x128xbf16>, vector<256x128xf32> -> vector<256x128xf32>
    %c0_3 = arith.constant 0 : index
    %c0_4 = arith.constant 0 : index
    %3 = vector.load %arg3[%c0_3, %c0_4] : memref<2x128xf32, #tpu.memory_space<vmem>>, vector<1x128xf32>
    %4 = vector.broadcast %3 : vector<1x128xf32> to vector<256x128xf32>
    %5 = arith.mulf %2, %4 : vector<256x128xf32>
    %c1 = arith.constant 1 : index
    %c0_5 = arith.constant 0 : index
    %6 = vector.load %arg3[%c1, %c0_5] : memref<2x128xf32, #tpu.memory_space<vmem>>, vector<1x128xf32>
    %7 = vector.broadcast %6 : vector<1x128xf32> to vector<256x128xf32>
    %8 = arith.addf %5, %7 : vector<256x128xf32>
    %cst_6 = arith.constant 0.000000e+00 : f32
    %9 = vector.broadcast %cst_6 : f32 to vector<256x128xf32>
    %10 = arith.maximumf %8, %9 : vector<256x128xf32>
    %c0_7 = arith.constant 0 : index
    %c0_8 = arith.constant 0 : index
    %11 = vector.load %arg4[%c0_7, %c0_8] : memref<256x128xf32, #tpu.memory_space<vmem>>, vector<256x128xf32>
    tpu.vector_store %arg4[%c0_7, %c0_8], %10 {strides = array<i32>} : memref<256x128xf32, #tpu.memory_space<vmem>>, vector<256x128xf32>,
    return
  }
  func.func @transform_0(%arg0: i32) -> (i32, i32) {
    %c0_i32 = arith.constant 0 : i32
    %c0_i32_0 = arith.constant 0 : i32
    return %arg0, %c0_i32 : i32, i32
  }
  func.func @transform_1(%arg0: i32) -> (i32, i32) {
    %c0_i32 = arith.constant 0 : i32
    %c0_i32_0 = arith.constant 0 : i32
    %c0_i32_1 = arith.constant 0 : i32
    return %c0_i32, %c0_i32_0 : i32, i32
  }
  func.func @transform_2(%arg0: i32) -> (i32, i32) {
    %c0_i32 = arith.constant 0 : i32
    %c0_i32_0 = arith.constant 0 : i32
    %c0_i32_1 = arith.constant 0 : i32
    return %c0_i32, %c0_i32_0 : i32, i32
  }
  func.func @transform_3(%arg0: i32) -> (i32, i32) {
    %c0_i32 = arith.constant 0 : i32
    %c0_i32_0 = arith.constant 0 : i32
    return %arg0, %c0_i32 : i32, i32
  }
}

</mosaic_0001>

<bundles_post_ra>
// kernel: basic_conv_forward_nhwc.1
= control target key start
LH: loop header
LB: loop body
LE: loop exit
PB: predicated region body
PF: predicated region fallthrough
CT: control target
= control target key end

     0   :  { %s881_s12 = smov 0   ;;  %s1053_s0 = inlined_call_operand.vmem [shape: bf16[512,48], index: 0, kind: input, shape index: {}]   ;;  %s1054_s1 = inlined_call_operand.vmem [shape: bf16[48,128], index: 1, kind: input, shape index: {}]   ;;  %s1055_s2 = inlined_call_operand.vmem [shape: f32[2,128], index: 2, kind: input, shape index: {}]   ;;  %s1056_s3 = inlined_call_operand.vmem [shape: f32[512,128], index: 3, kind: output, shape index: {}]  }
   0x1 LB: > { %s715_s13 = sadd.s32 4294967295, %s859_s12   ;;  %p719_p0 = scmp.ge.s32.totalorder %s859_s12, 1  ;;  %s859_s12 = sphi %s881_s12, %s13_s12  }
   0x2   : > { %p138_p1 = scmp.lt.s32.totalorder %s859_s12, 3 }
   0x4   : > { %p139_p2 = pnand %p719_p0, %p138_p1 }
   0x5   : > { %v834_v0 = vld [vmem:[%s1054_s1] sm:$0xff] (!%p139_p2)   ;;  %s720_s16 = sshll.u32 (!%p139_p2), %s715_s13, 5  ;;  %v835_v1 = vld [vmem:[%s1054_s1 + $0x8] sm:$0xff] (!%p139_p2)   ;;  %v836_v2 = vld [vmem:[%s1054_s1 + $0x10] sm:$0xff] (!%p139_p2)   ;;  %vm311_vm0 = vcmask (!%p139_p2), 392192  }
   0x6   : > { %142 = sbr.rel (%p139_p2) target bundleno = 265 (0x109), region = 32  ;;  %p163_p3 = scmp.lt.s32.totalorder (!%p139_p2), %s720_s16, 63  ;;  %782 = vmatprep.subr.bf16.mxu0 (!%p139_p2), %v834_v0  ;;  %820 = vmatprep.subr.bf16.mxu1 (!%p139_p2), %v834_v0  ;;  %v941_v19 = vld [vmem:[%s1055_s2] ss:$0 sm:$0xff] (!%p139_p2)  ;;  %v946_v21 = vld [vmem:[%s1055_s2 + $0x1] ss:$0 sm:$0xff] (!%p139_p2) }
   0x7   : > { %783 = vmatpush3.bf16.msra.mxu0 (!%p139_p2), %v834_v0  ;;  %823 = vmatpush3.bf16.msra.mxu1 (!%p139_p2), %v834_v0 }
   0x8   : > { %784 = vmatprep.subr.bf16.mxu0 (!%p139_p2), %v835_v1  ;;  %821 = vmatprep.subr.bf16.mxu1 (!%p139_p2), %v835_v1 }
   0xb   : > { %785 = vmatpush3.bf16.msra.mxu0 (!%p139_p2), %v835_v1  ;;  %824 = vmatpush3.bf16.msra.mxu1 (!%p139_p2), %v835_v1 }
   0xc   : > { %786 = vmatprep.subr.bf16.mxu0 (!%p139_p2), %v836_v2  ;;  %822 = vmatprep.subr.bf16.mxu1 (!%p139_p2), %v836_v2 }
   0xd   : > { %s1058_s16 = smov (!%p163_p3, %s720_s16), 63 }
   0xe   : > { %s721_s21 = sshll.u32 %s1058_s16, 2  ;;  %s723_s29 = sshll.u32 %s1058_s16, 3 }
   0xf   : > { %s904_s24 = scalar_lea.vmem %s1053_s0, %s721_s21  ;;  %787 = vmatpush3.bf16.msra.mxu0 %v836_v2  ;;  %825 = vmatpush3.bf16.msra.mxu1 %v836_v2  ;;  %s960_s5 = scalar_lea.vmem %s1056_s3, %s723_s29 }
  0x10   : > { %v837_v3 = vld [vmem:[%s904_s24] sm:$0xff]   ;;  %v839_v5 = vld [vmem:[%s904_s24 + $0x8] sm:$0xff]   ;;  %v841_v7 = vld [vmem:[%s904_s24 + $0x10] sm:$0xff]  }
  0x11   : > { %v838_v4 = vld [vmem:[%s904_s24 + $0x40] sm:$0xff]   ;;  %788 = vmatprep.mubr.msk.bf16.mxu0 %vm311_vm0, %v837_v3  ;;  %v840_v6 = vld [vmem:[%s904_s24 + $0x48] sm:$0xff]   ;;  %v842_v8 = vld [vmem:[%s904_s24 + $0x50] sm:$0xff]  }
  0x12   : > { %804 = vmatprep.mubr.msk.bf16.mxu1 %vm311_vm0, %v838_v4  ;;  %789 = vmatmul.mubr.msk.bf16.vlgmr.msra.gmra.mrb[0].mxu0 %vm311_vm0, %v839_v5  ;;  %v843_v9 = vld [vmem:[%s904_s24 + $0x18] sm:$0xff]   ;;  %v845_v11 = vld [vmem:[%s904_s24 + $0x20] sm:$0xff]   ;;  %v847_v13 = vld [vmem:[%s904_s24 + $0x28] sm:$0xff]  }
  0x13   : > { %805 = vmatmul.mubr.msk.bf16.vlgmr.msra.gmra.mrb[0].mxu1 %vm311_vm0, %v840_v6  ;;  %792 = vmatprep.mubr.msk.bf16.mxu0 %vm311_vm0, %v841_v7  ;;  %v844_v10 = vld [vmem:[%s904_s24 + $0x58] sm:$0xff]   ;;  %v846_v12 = vld [vmem:[%s904_s24 + $0x60] sm:$0xff]   ;;  %v848_v14 = vld [vmem:[%s904_s24 + $0x68] sm:$0xff]  }
  0x14   : > { %808 = vmatprep.mubr.msk.bf16.mxu1 %vm311_vm0, %v842_v8  ;;  %v849_v15 = vld [vmem:[%s904_s24 + $0x30] sm:$0xff]   ;;  %v851_v17 = vld [vmem:[%s904_s24 + $0x38] sm:$0xff]  }
  0x15   : > { %v850_v16 = vld [vmem:[%s904_s24 + $0x70] sm:$0xff]   ;;  %v852_v18 = vld [vmem:[%s904_s24 + $0x78] sm:$0xff]  }
  0x1a   : > { %793 = vmatmul.mubr.msk.bf16.gmra.mrb[4].mxu0 %vm311_vm0, %v843_v9 }
  0x1b   : > { %809 = vmatmul.mubr.msk.bf16.gmra.mrb[4].mxu1 %vm311_vm0, %v844_v10  ;;  %796 = vmatprep.mubr.msk.bf16.mxu0 %vm311_vm0, %v845_v11 }
  0x1c   : > { %812 = vmatprep.mubr.msk.bf16.mxu1 %vm311_vm0, %v846_v12 }
  0x22   : > { %797 = vmatmul.mubr.msk.bf16.gmra.mrb[8].mxu0 %vm311_vm0, %v847_v13 }
  0x23   : > { %813 = vmatmul.mubr.msk.bf16.gmra.mrb[8].mxu1 %vm311_vm0, %v848_v14  ;;  %800 = vmatprep.mubr.msk.bf16.mxu0 %vm311_vm0, %v849_v15 }
  0x24   : > { %816 = vmatprep.mubr.msk.bf16.mxu1 %vm311_vm0, %v850_v16 }
  0x2a   : > { %801 = vmatmul.mubr.msk.bf16.gmra.mrb[12].mxu0 %vm311_vm0, %v851_v17 }
  0x2b   : > { %817 = vmatmul.mubr.msk.bf16.gmra.mrb[12].mxu1 %vm311_vm0, %v852_v18 }
  0xe5   : > { %v790_v20 = vpop.f32.mrb[0].mxu0 }
  0xe6   : > { %v806_v22 = vpop.f32.mrb[0].mxu1  ;;  %v528_v23 = vmul.f32 %v790_v20, %v941_v19  ;;  %v394_v25 = vpop.f32.mrb[1].mxu0 }
  0xe7   : > { %v544_v24 = vmul.f32 %v806_v22, %v941_v19  ;;  %v458_v26 = vpop.f32.mrb[1].mxu1  ;;  %v526_v27 = vmul.f32 %v941_v19, %v394_v25  ;;  %v791_v29 = vpop.f32.mrb[2].mxu0 }
  0xe8   : > { %v542_v28 = vmul.f32 %v941_v19, %v458_v26  ;;  %v807_v30 = vpop.f32.mrb[2].mxu1  ;;  %v565_v31 = vadd.f32 %v946_v21, %v528_v23  ;;  %v529_v33 = vmul.f32 %v791_v29, %v941_v19  ;;  %v397_v35 = vpop.f32.mrb[3].mxu0 }
  0xe9   : > { %v581_v32 = vadd.f32 %v946_v21, %v544_v24  ;;  %v545_v34 = vmul.f32 %v807_v30, %v941_v19  ;;  %v461_v36 = vpop.f32.mrb[3].mxu1  ;;  %v563_v37 = vadd.f32 %v946_v21, %v526_v27  ;;  %v527_v39 = vmul.f32 %v941_v19, %v397_v35 }
  0xea   : > { %v579_v38 = vadd.f32 %v946_v21, %v542_v28  ;;  %v543_v40 = vmul.f32 %v941_v19, %v461_v36  ;;  %v597_v41 = vmax.f32 %v565_v31, 0.0  ;;  %v566_v43 = vadd.f32 %v946_v21, %v529_v33 }
  0xeb   : > { %v613_v42 = vmax.f32 %v581_v32, 0.0  ;;  %v582_v44 = vadd.f32 %v946_v21, %v545_v34  ;;  %v595_v45 = vmax.f32 %v563_v37, 0.0  ;;  %v564_v47 = vadd.f32 %v946_v21, %v527_v39 }
  0xec   : > { %v611_v46 = vmax.f32 %v579_v38, 0.0  ;;  %v580_v48 = vadd.f32 %v946_v21, %v543_v40  ;;  %629 = vst [vmem:[%s960_s5 + $0x10] sm:$0xff] %v597_v41  ;;  %v598_v49 = vmax.f32 %v566_v43, 0.0 }
  0xed   : > { %645 = vst [vmem:[%s960_s5 + $0x90] sm:$0xff] %v613_v42  ;;  %v614_v50 = vmax.f32 %v582_v44, 0.0  ;;  %627 = vst [vmem:[%s960_s5] sm:$0xff] %v595_v45  ;;  %v596_v51 = vmax.f32 %v564_v47, 0.0  ;;  %v794_v53 = vpop.f32.mrb[4].mxu0 }
  0xee   : > { %643 = vst [vmem:[%s960_s5 + $0x80] sm:$0xff] %v611_v46  ;;  %v612_v52 = vmax.f32 %v580_v48, 0.0  ;;  %v810_v54 = vpop.f32.mrb[4].mxu1  ;;  %630 = vst [vmem:[%s960_s5 + $0x18] sm:$0xff] %v598_v49  ;;  %v532_v55 = vmul.f32 %v794_v53, %v941_v19  ;;  %v410_v57 = vpop.f32.mrb[5].mxu0 }
  0xef   : > { %646 = vst [vmem:[%s960_s5 + $0x98] sm:$0xff] %v614_v50  ;;  %v548_v56 = vmul.f32 %v810_v54, %v941_v19  ;;  %v474_v58 = vpop.f32.mrb[5].mxu1  ;;  %628 = vst [vmem:[%s960_s5 + $0x8] sm:$0xff] %v596_v51  ;;  %v530_v59 = vmul.f32 %v941_v19, %v410_v57  ;;  %v795_v61 = vpop.f32.mrb[6].mxu0 }
  0xf0   : > { %644 = vst [vmem:[%s960_s5 + $0x88] sm:$0xff] %v612_v52  ;;  %v546_v60 = vmul.f32 %v941_v19, %v474_v58  ;;  %v811_v62 = vpop.f32.mrb[6].mxu1  ;;  %v569_v63 = vadd.f32 %v946_v21, %v532_v55  ;;  %v533_v1 = vmul.f32 %v795_v61, %v941_v19  ;;  %v413_v3 = vpop.f32.mrb[7].mxu0 }
  0xf1   : > { %v585_v0 = vadd.f32 %v946_v21, %v548_v56  ;;  %v549_v2 = vmul.f32 %v811_v62, %v941_v19  ;;  %v477_v4 = vpop.f32.mrb[7].mxu1  ;;  %v567_v5 = vadd.f32 %v946_v21, %v530_v59  ;;  %v531_v7 = vmul.f32 %v941_v19, %v413_v3 }
  0xf2   : > { %v583_v6 = vadd.f32 %v946_v21, %v546_v60  ;;  %v547_v8 = vmul.f32 %v941_v19, %v477_v4  ;;  %v601_v9 = vmax.f32 %v569_v63, 0.0  ;;  %v570_v11 = vadd.f32 %v946_v21, %v533_v1 }
  0xf3   : > { %v617_v10 = vmax.f32 %v585_v0, 0.0  ;;  %v586_v12 = vadd.f32 %v946_v21, %v549_v2  ;;  %v599_v13 = vmax.f32 %v567_v5, 0.0  ;;  %v568_v15 = vadd.f32 %v946_v21, %v531_v7 }
  0xf4   : > { %v615_v14 = vmax.f32 %v583_v6, 0.0  ;;  %v584_v16 = vadd.f32 %v946_v21, %v547_v8  ;;  %633 = vst [vmem:[%s960_s5 + $0x30] sm:$0xff] %v601_v9  ;;  %v602_v17 = vmax.f32 %v570_v11, 0.0 }
  0xf5   : > { %649 = vst [vmem:[%s960_s5 + $0xb0] sm:$0xff] %v617_v10  ;;  %v618_v18 = vmax.f32 %v586_v12, 0.0  ;;  %631 = vst [vmem:[%s960_s5 + $0x20] sm:$0xff] %v599_v13  ;;  %v600_v20 = vmax.f32 %v568_v15, 0.0  ;;  %v798_v23 = vpop.f32.mrb[8].mxu0 }
  0xf6   : > { %647 = vst [vmem:[%s960_s5 + $0xa0] sm:$0xff] %v615_v14  ;;  %v616_v22 = vmax.f32 %v584_v16, 0.0  ;;  %v814_v24 = vpop.f32.mrb[8].mxu1  ;;  %634 = vst [vmem:[%s960_s5 + $0x38] sm:$0xff] %v602_v17  ;;  %v536_v25 = vmul.f32 %v798_v23, %v941_v19  ;;  %v426_v27 = vpop.f32.mrb[9].mxu0 }
  0xf7   : > { %650 = vst [vmem:[%s960_s5 + $0xb8] sm:$0xff] %v618_v18  ;;  %v552_v26 = vmul.f32 %v814_v24, %v941_v19  ;;  %v490_v28 = vpop.f32.mrb[9].mxu1  ;;  %632 = vst [vmem:[%s960_s5 + $0x28] sm:$0xff] %v600_v20  ;;  %v534_v29 = vmul.f32 %v941_v19, %v426_v27  ;;  %v799_v31 = vpop.f32.mrb[10].mxu0 }
  0xf8   : > { %648 = vst [vmem:[%s960_s5 + $0xa8] sm:$0xff] %v616_v22  ;;  %v550_v30 = vmul.f32 %v941_v19, %v490_v28  ;;  %v815_v32 = vpop.f32.mrb[10].mxu1  ;;  %v573_v33 = vadd.f32 %v946_v21, %v536_v25  ;;  %v537_v35 = vmul.f32 %v799_v31, %v941_v19  ;;  %v429_v37 = vpop.f32.mrb[11].mxu0 }
  0xf9   : > { %v589_v34 = vadd.f32 %v946_v21, %v552_v26  ;;  %v553_v36 = vmul.f32 %v815_v32, %v941_v19  ;;  %v493_v38 = vpop.f32.mrb[11].mxu1  ;;  %v571_v39 = vadd.f32 %v946_v21, %v534_v29  ;;  %v535_v41 = vmul.f32 %v941_v19, %v429_v37 }
  0xfa   : > { %v587_v40 = vadd.f32 %v946_v21, %v550_v30  ;;  %v551_v42 = vmul.f32 %v941_v19, %v493_v38  ;;  %v605_v43 = vmax.f32 %v573_v33, 0.0  ;;  %v574_v45 = vadd.f32 %v946_v21, %v537_v35 }
  0xfb   : > { %v621_v44 = vmax.f32 %v589_v34, 0.0  ;;  %v590_v46 = vadd.f32 %v946_v21, %v553_v36  ;;  %v603_v47 = vmax.f32 %v571_v39, 0.0  ;;  %v572_v49 = vadd.f32 %v946_v21, %v535_v41 }
  0xfc   : > { %v619_v48 = vmax.f32 %v587_v40, 0.0  ;;  %v588_v50 = vadd.f32 %v946_v21, %v551_v42  ;;  %637 = vst [vmem:[%s960_s5 + $0x50] sm:$0xff] %v605_v43  ;;  %v606_v51 = vmax.f32 %v574_v45, 0.0 }
  0xfd   : > { %653 = vst [vmem:[%s960_s5 + $0xd0] sm:$0xff] %v621_v44  ;;  %v622_v52 = vmax.f32 %v590_v46, 0.0  ;;  %635 = vst [vmem:[%s960_s5 + $0x40] sm:$0xff] %v603_v47  ;;  %v604_v53 = vmax.f32 %v572_v49, 0.0  ;;  %v802_v55 = vpop.f32.mrb[12].mxu0 }
  0xfe   : > { %651 = vst [vmem:[%s960_s5 + $0xc0] sm:$0xff] %v619_v48  ;;  %v620_v54 = vmax.f32 %v588_v50, 0.0  ;;  %v818_v56 = vpop.f32.mrb[12].mxu1  ;;  %638 = vst [vmem:[%s960_s5 + $0x58] sm:$0xff] %v606_v51  ;;  %v540_v57 = vmul.f32 %v802_v55, %v941_v19  ;;  %v442_v59 = vpop.f32.mrb[13].mxu0 }
  0xff   : > { %654 = vst [vmem:[%s960_s5 + $0xd8] sm:$0xff] %v622_v52  ;;  %v556_v58 = vmul.f32 %v818_v56, %v941_v19  ;;  %v506_v60 = vpop.f32.mrb[13].mxu1  ;;  %636 = vst [vmem:[%s960_s5 + $0x48] sm:$0xff] %v604_v53  ;;  %v538_v61 = vmul.f32 %v941_v19, %v442_v59  ;;  %v803_v63 = vpop.f32.mrb[14].mxu0 }
 0x100   : > { %652 = vst [vmem:[%s960_s5 + $0xc8] sm:$0xff] %v620_v54  ;;  %v554_v62 = vmul.f32 %v941_v19, %v506_v60  ;;  %v819_v0 = vpop.f32.mrb[14].mxu1  ;;  %v577_v1 = vadd.f32 %v946_v21, %v540_v57  ;;  %v541_v3 = vmul.f32 %v803_v63, %v941_v19  ;;  %v445_v5 = vpop.f32.mrb[15].mxu0 }
 0x101   : > { %v593_v2 = vadd.f32 %v946_v21, %v556_v58  ;;  %v557_v4 = vmul.f32 %v819_v0, %v941_v19  ;;  %v509_v6 = vpop.f32.mrb[15].mxu1  ;;  %v575_v7 = vadd.f32 %v946_v21, %v538_v61  ;;  %v539_v9 = vmul.f32 %v941_v19, %v445_v5 }
 0x102   : > { %v591_v8 = vadd.f32 %v946_v21, %v554_v62  ;;  %v555_v10 = vmul.f32 %v941_v19, %v509_v6  ;;  %v609_v11 = vmax.f32 %v577_v1, 0.0  ;;  %v578_v13 = vadd.f32 %v946_v21, %v541_v3 }
 0x103   : > { %v625_v12 = vmax.f32 %v593_v2, 0.0  ;;  %v594_v14 = vadd.f32 %v946_v21, %v557_v4  ;;  %v607_v15 = vmax.f32 %v575_v7, 0.0  ;;  %v576_v17 = vadd.f32 %v946_v21, %v539_v9 }
 0x104   : > { %v623_v16 = vmax.f32 %v591_v8, 0.0  ;;  %v592_v18 = vadd.f32 %v946_v21, %v555_v10  ;;  %641 = vst [vmem:[%s960_s5 + $0x70] sm:$0xff] %v609_v11  ;;  %v610_v20 = vmax.f32 %v578_v13, 0.0 }
 0x105   : > { %657 = vst [vmem:[%s960_s5 + $0xf0] sm:$0xff] %v625_v12  ;;  %v626_v19 = vmax.f32 %v594_v14, 0.0  ;;  %639 = vst [vmem:[%s960_s5 + $0x60] sm:$0xff] %v607_v15  ;;  %v608_v22 = vmax.f32 %v576_v17, 0.0 }
 0x106   : > { %655 = vst [vmem:[%s960_s5 + $0xe0] sm:$0xff] %v623_v16  ;;  %v624_v23 = vmax.f32 %v592_v18, 0.0  ;;  %642 = vst [vmem:[%s960_s5 + $0x78] sm:$0xff] %v610_v20 }
 0x107   : > { %658 = vst [vmem:[%s960_s5 + $0xf8] sm:$0xff] %v626_v19  ;;  %640 = vst [vmem:[%s960_s5 + $0x68] sm:$0xff] %v608_v22 }
 0x108   : > { %656 = vst [vmem:[%s960_s5 + $0xe8] sm:$0xff] %v624_v23 }
 0x109 PF: > { %s13_s12 = sadd.s32 1, %s859_s12  }
 0x10a   : > { %p10_p4 = scmp.ge.s32.totalorder %s13_s12, 4  }
 0x10c   :  { %12 = sbr.rel (!%p10_p4) target bundleno = 1 (0x1), region = 62 }

</bundles_post_ra>
